<compile_context>
chip_gen: v6e
topology: v6e:2x2x1
jax: 0.10.0
libtpu: 0.0.40
codegen_flags: <defaults>
</compile_context>

<pallas_src>
import math
from functools import partial

import jax
import jax.numpy as jnp
from jax.experimental import pallas as pl
from jax.experimental.pallas import tpu as pltpu


def _round_up(x, m):
    return (x + m - 1) // m * m


def _gather_scale_kernel(ids_ref, table_hbm, out_ref, gather_buf, copy_sems, *,
                         rows_per_step, scale):
    """One grid step: gather `rows_per_step` embedding rows, scale, store.

    ids_ref    : (N_pad,) int32 in SMEM (scalar prefetch) -- all token ids.
    table_hbm  : (V, D) raw HBM ref (memory_space=pl.ANY) -- embedding table.
    out_ref    : (R, D) VMEM output block for this chunk.
    gather_buf : (R, D) VMEM scratch the row-gather DMAs land in.
    copy_sems  : (R,) DMA semaphores, one per in-flight row copy.
    """
    step = pl.program_id(0)
    base = step * rows_per_step

    # Issue all R row-gather DMAs for this chunk; they are all in flight
    # concurrently, which is what amortizes the small per-row transfer.
    @pl.loop(0, rows_per_step)
    def _issue(r):
        row = ids_ref[base + r]
        pltpu.make_async_copy(table_hbm.at[row], gather_buf.at[r],
                              copy_sems.at[r]).start()

    # Wait for every row of this chunk (src index is a dummy; only the shape
    # and the semaphore matter for wait()).
    @pl.loop(0, rows_per_step)
    def _wait(r):
        pltpu.make_async_copy(table_hbm.at[0], gather_buf.at[r],
                              copy_sems.at[r]).wait()

    # The scale multiply rides in VPU slack (kernel is HBM-bound). Emit one
    # dense, lane- and sublane-dense (R, D) block -> full-width unmasked vst.
    out_ref[...] = (gather_buf[...].astype(jnp.float32) * scale).astype(out_ref.dtype)


def input_embeddings_forward(token_ids, table, *, block_rows=256):
    """token_ids: (B, S) integer; table: (V, D) float -> (B, S, D) in table.dtype."""
    b, s = token_ids.shape
    v, d = table.shape
    n = b * s
    scale = float(math.sqrt(d))

    # Chunk size: multiple of 16 (sublane-dense for f32 and bf16 output
    # blocks), capped at the padded token count so tiny inputs stay one step.
    r = min(_round_up(block_rows, 16), _round_up(n, 16))
    n_pad = _round_up(n, r)

    # Token ids live on the scalar path (SMEM), not in a wasteful VMEM tile.
    # Clamp so a bad id can never make a DMA read outside the table.
    # TODO(synk): PyTorch raises on out-of-range ids; we clamp instead (no
    # in-kernel error reporting on TPU).
    ids_flat = jnp.clip(token_ids.reshape(n).astype(jnp.int32), 0, v - 1)
    ids_pad = jnp.pad(ids_flat, (0, n_pad - n))  # pad rows gather row 0; sliced off below

    itemsize = jnp.dtype(table.dtype).itemsize
    cost = pl.CostEstimate(
        flops=n_pad * d,                                       # the scale multiply
        transcendentals=0,
        bytes_accessed=n_pad * d * itemsize * 2 + n_pad * 4,   # row reads + out writes + ids
    )

    out_flat = pl.pallas_call(
        partial(_gather_scale_kernel, rows_per_step=r, scale=scale),
        out_shape=jax.ShapeDtypeStruct((n_pad, d), table.dtype),
        grid_spec=pltpu.PrefetchScalarGridSpec(
            num_scalar_prefetch=1,
            grid=(n_pad // r,),
            in_specs=[
                # Table stays in HBM; rows are gathered with manual DMAs.
                pl.BlockSpec(memory_space=pl.ANY),
            ],
            out_specs=pl.BlockSpec((r, d), lambda i, ids: (i, 0)),
            scratch_shapes=[
                pltpu.VMEM((r, d), table.dtype),
                pltpu.SemaphoreType.DMA((r,)),
            ],
        ),
        compiler_params=pltpu.CompilerParams(
            # Chunks are independent and self-contained -> megacore-shardable.
            dimension_semantics=("parallel",),
        ),
        cost_estimate=cost,
    )(ids_pad, table)

    return out_flat[:n].reshape(b, s, d)


def make_embedding_table(key, vocab_size, embedding_dim, pad_token_id=None):
    """Deterministic init matching nn.init.normal_(std=0.02) + zeroed pad row."""
    table = 0.02 * jax.random.normal(
        key, (vocab_size, embedding_dim), dtype=jnp.float32)
    if pad_token_id is not None:
        table = table.at[pad_token_id].set(0.0)
    return table


if __name__ == "__main__":
    key = jax.random.PRNGKey(0)
    k_tab, k_ids = jax.random.split(key)

    vocab_size = 512
    embedding_dim = 128   # lane-dense output block (multiple of 128)
    batch, seq_len = 2, 8
    pad_token_id = 0

    table = make_embedding_table(k_tab, vocab_size, embedding_dim, pad_token_id)
    token_ids = jax.random.randint(
        k_ids, (batch, seq_len), 0, vocab_size, dtype=jnp.int32)

    out = input_embeddings_forward(token_ids, table)
    jax.block_until_ready(out)

    # Reference check against plain-JAX gather semantics (== nn.Embedding * sqrt(d)).
    ref = table[token_ids] * math.sqrt(embedding_dim)
    assert out.shape == (batch, seq_len, embedding_dim)
    assert jnp.allclose(out, ref, atol=1e-5, rtol=1e-5)

    print("KERNEL_OK")
</pallas_src>

<mosaic_0001>
module attributes {stable_mosaic.version = 11 : i64} {
  func.func @_gather_scale_kernel(%arg0: i32, %arg1: memref<16xi32, #tpu.memory_space<smem>>, %arg2: memref<512x128xf32, #tpu.memory_space<any>>, %arg3: memref<16x128xf32, #tpu.memory_space<vmem>>, %arg4: memref<16x128xf32, #tpu.memory_space<vmem>>, %arg5: memref<16x!tpu.dma_semaphore, #tpu.memory_space<semaphore_mem>>) attributes {dimension_semantics = [#tpu.dimension_semantics<parallel>], iteration_bounds = array<i64: 1>, scalar_prefetch = 1 : i64, scratch_operands = 2 : i64, tpu.core_type = #tpu.core_type<tc>, window_params = [{}, {transform_indices = @transform_1, window_bounds = array<i64: 16, 128>}]} {
    %c16_i32 = arith.constant 16 : i32
    %0 = arith.muli %arg0, %c16_i32 : i32
    %c0_i32 = arith.constant 0 : i32
    %c16_i32_0 = arith.constant 16 : i32
    %1 = arith.addi %c0_i32, %c16_i32_0 : i32
    %c1_i32 = arith.constant 1 : i32
    scf.for %arg6 = %c0_i32 to %1 step %c1_i32  : i32 {
      %c1_i32_9 = arith.constant 1 : i32
      %7 = arith.muli %arg6, %c1_i32_9 : i32
      %c0_i32_10 = arith.constant 0 : i32
      %8 = arith.addi %c0_i32_10, %7 : i32
      %9 = arith.addi %0, %8 : i32
      %10 = arith.index_cast %9 : i32 to index
      %11 = memref.load %arg1[%10] : memref<16xi32, #tpu.memory_space<smem>>
      %c0_i32_11 = arith.constant 0 : i32
      %12 = tpu.memref_slice %arg2[%11, %c0_i32_11] : memref<512x128xf32, #tpu.memory_space<any>> -> memref<1x128xf32, #tpu.memory_space<any>>
      %13 = tpu.memref_squeeze %12 : memref<1x128xf32, #tpu.memory_space<any>> -> memref<128xf32, #tpu.memory_space<any>>
      %c0_i32_12 = arith.constant 0 : i32
      %14 = tpu.memref_slice %arg4[%8, %c0_i32_12] : memref<16x128xf32, #tpu.memory_space<vmem>> -> memref<1x128xf32, #tpu.memory_space<vmem>>
      %15 = tpu.memref_squeeze %14 : memref<1x128xf32, #tpu.memory_space<vmem>> -> memref<128xf32, #tpu.memory_space<vmem>>
      %16 = tpu.memref_slice %arg5[%8] : memref<16x!tpu.dma_semaphore, #tpu.memory_space<semaphore_mem>> -> memref<1x!tpu.dma_semaphore, #tpu.memory_space<semaphore_mem>>
      %17 = tpu.memref_squeeze %16 : memref<1x!tpu.dma_semaphore, #tpu.memory_space<semaphore_mem>> -> memref<!tpu.dma_semaphore, #tpu.memory_space<semaphore_mem>>
      tpu.enqueue_dma source(%13 : memref<128xf32, #tpu.memory_space<any>>) target(%15 : memref<128xf32, #tpu.memory_space<vmem>>) target_semaphore(%17 : memref<!tpu.dma_semaphore, #tpu.memory_space<semaphore_mem>>)
    }
    %c16_i32_1 = arith.constant 16 : i32
    %c0_i32_2 = arith.constant 0 : i32
    %c16_i32_3 = arith.constant 16 : i32
    %2 = arith.addi %c0_i32_2, %c16_i32_3 : i32
    %c1_i32_4 = arith.constant 1 : i32
    scf.for %arg6 = %c0_i32_2 to %2 step %c1_i32_4  : i32 {
      %c1_i32_9 = arith.constant 1 : i32
      %7 = arith.muli %arg6, %c1_i32_9 : i32
      %c0_i32_10 = arith.constant 0 : i32
      %8 = arith.addi %c0_i32_10, %7 : i32
      %c0_i32_11 = arith.constant 0 : i32
      %c0_i32_12 = arith.constant 0 : i32
      %9 = tpu.memref_slice %arg2[%c0_i32_11, %c0_i32_12] : memref<512x128xf32, #tpu.memory_space<any>> -> memref<1x128xf32, #tpu.memory_space<any>>
      %10 = tpu.memref_squeeze %9 : memref<1x128xf32, #tpu.memory_space<any>> -> memref<128xf32, #tpu.memory_space<any>>
      %c0_i32_13 = arith.constant 0 : i32
      %11 = tpu.memref_slice %arg4[%8, %c0_i32_13] : memref<16x128xf32, #tpu.memory_space<vmem>> -> memref<1x128xf32, #tpu.memory_space<vmem>>
      %12 = tpu.memref_squeeze %11 : memref<1x128xf32, #tpu.memory_space<vmem>> -> memref<128xf32, #tpu.memory_space<vmem>>
      %13 = tpu.memref_slice %arg5[%8] : memref<16x!tpu.dma_semaphore, #tpu.memory_space<semaphore_mem>> -> memref<1x!tpu.dma_semaphore, #tpu.memory_space<semaphore_mem>>
      %14 = tpu.memref_squeeze %13 : memref<1x!tpu.dma_semaphore, #tpu.memory_space<semaphore_mem>> -> memref<!tpu.dma_semaphore, #tpu.memory_space<semaphore_mem>>
      tpu.wait_dma2 semaphore(%14 : memref<!tpu.dma_semaphore, #tpu.memory_space<semaphore_mem>>) src(%10 : memref<128xf32, #tpu.memory_space<any>>) dst(%12 : memref<128xf32, #tpu.memory_space<vmem>>)
    }
    %c16_i32_5 = arith.constant 16 : i32
    %c0 = arith.constant 0 : index
    %c0_6 = arith.constant 0 : index
    %3 = vector.load %arg4[%c0, %c0_6] : memref<16x128xf32, #tpu.memory_space<vmem>>, vector<16x128xf32>
    %cst = arith.constant 11.3137083 : f32
    %4 = vector.broadcast %cst : f32 to vector<16x128xf32>
    %5 = arith.mulf %3, %4 : vector<16x128xf32>
    %c0_7 = arith.constant 0 : index
    %c0_8 = arith.constant 0 : index
    %6 = vector.load %arg3[%c0_7, %c0_8] : memref<16x128xf32, #tpu.memory_space<vmem>>, vector<16x128xf32>
    tpu.vector_store %arg3[%c0_7, %c0_8], %5 {strides = array<i32>} : memref<16x128xf32, #tpu.memory_space<vmem>>, vector<16x128xf32>,
    return
  }
  func.func @transform_1(%arg0: i32, %arg1: memref<16xi32, #tpu.memory_space<smem>>) -> (i32, i32) {
    %c0_i32 = arith.constant 0 : i32
    %c0_i32_0 = arith.constant 0 : i32
    return %arg0, %c0_i32 : i32, i32
  }
}

</mosaic_0001>

<bundles_post_ra>
// kernel: tpu_custom_call.1
= control target key start
LH: loop header
LB: loop body
LE: loop exit
PB: predicated region body
PF: predicated region fallthrough
CT: control target
= control target key end

     0   :  { %s302_s9 = smov [#allocation5]   ;;  %s348_s0 = inlined_call_operand.hbm [shape: s32[16], index: 0, kind: input, shape index: {}]   ;;  %s349_s1 = inlined_call_operand.hbm [shape: f32[512,128], index: 1, kind: input, shape index: {}]   ;;  %s350_s2 = inlined_call_operand.hbm [shape: f32[16,128], index: 2, kind: output, shape index: {}]  }
   0x1   :  { %8 = dma.hbm_to_smem %s348_s0, 16, %s302_s9, [#allocation4] }
   0x2   :  { %288 = dma.done.wait [#allocation4], 16 }
   0x3   :  { %289 = vsyncadd [#allocation4], 4294967280 }
   0x4   :  { %10 = sfence }
   0x5   :  { %11 = vsyncpa [#allocation7], 0  ;;  %s325_s12 = smov 0  }
   0x6 LB: > { %s20_s13 = sld [smem:[#allocation5 + %s296_s12]]  ;;  %s23_s14 = scalar_lea.vmem [#allocation2], %s296_s12  ;;  %s296_s12 = sphi %s325_s12, %s18_s12  }
   0x7   : > { %s32_s15 = sshll.u32 %s23_s14, 4  ;;  %s24_s19 = scalar_lea.sflag [#allocation3], %s296_s12  ;;  %s33_s15 = int_to_ptr.vmem [resolvable:$true] %s32_s15 }
   0x8   : > { %s240_s23 = scalar_lea.hbm %s349_s1, 8192 }
   0xc   : > { %s193_s16 = sshll.u32 %s20_s13, 4 }
   0xd   : > { %s22_s18 = scalar_lea.hbm %s349_s1, %s193_s16 }
   0xe   : > { %s238_s20 = scalar_lea.hbm %s22_s18, 16  ;;  %p241_p1 = scmp.lt.s32.totalorder %s22_s18, %s349_s1 }
   0xf   : > { %p239_p0 = scmp.ne.s32.totalorder %s22_s18, %s238_s20  ;;  %p242_p2 = scmp.lt.s32.totalorder %s240_s23, %s238_s20 }
  0x11   : > { %p243_p3 = por %p242_p2, %p241_p1 }
  0x13   : > { %p244_p4 = pnand %p243_p3, %p239_p0 }
  0x15   : > { %247 = shalt.err (!%p244_p4)  }
  0x16   : > { %s248_s26 = scalar_lea.vmem %s33_s15, 16  ;;  %s303_s27 = smov [#allocation2]  }
  0x17   : > { %p249_p5 = scmp.ne.s32.totalorder %s33_s15, %s248_s26  ;;  %s250_s28 = sshll.u32 %s303_s27, 4  ;;  %s251_s28 = int_to_ptr.vmem [resolvable:$false] %s250_s28 }
  0x18   : > { %s252_s29 = scalar_lea.vmem %s251_s28, 256  ;;  %p253_p6 = scmp.lt.s32.totalorder %s33_s15, %s251_s28 }
  0x19   : > { %p254_p7 = scmp.lt.s32.totalorder %s252_s29, %s248_s26 }
  0x1b   : > { %p255_p8 = por %p254_p7, %p253_p6 }
  0x1d   : > { %p256_p9 = pnand %p255_p8, %p249_p5 }
  0x1f   : > { %259 = shalt.err (!%p256_p9)  }
  0x20   : > { %35 = dma.hbm_to_vmem [thread:$0]  %s22_s18, 16, %s33_s15, %s24_s19 }
  0x21   : > { %s18_s12 = sadd.s32 1, %s296_s12  }
  0x22   : > { %p15_p10 = scmp.ge.s32.totalorder %s18_s12, 16  }
  0x23   :  { %s298_s30 = smov (%p15_p10), 0  }
  0x24   :  { %17 = sbr.rel (!%p15_p10) target bundleno = 6 (0x6), region = 57 }
  0x29 LB: > { %s42_s3 = scalar_lea.sflag [#allocation3], %s300_s30  ;;  %s300_s30 = sphi %s298_s30, %s41_s30  }
  0x2a   : > { %290 = dma.done.wait %s42_s3, 16 }
  0x2b   : > { %291 = vsyncadd %s42_s3, 4294967280  ;;  %s41_s30 = sadd.s32 1, %s300_s30  }
  0x2c   : > { %p38_p11 = scmp.ge.s32.totalorder %s41_s30, 16  }
  0x2d   :  { %v45_v0 = vld [vmem:[#allocation2] sm:$0xff] (%p38_p11)  ;;  %v46_v1 = vld [vmem:[#allocation2 + $0x8] sm:$0xff] (%p38_p11)  ;;  %s304_s4 = smov (%p38_p11), [#allocation6]  }
  0x2e   :  { %40 = sbr.rel (!%p38_p11) target bundleno = 41 (0x29), region = 68  ;;  %v47_v2 = vmul.f32 (%p38_p11), 11.313708, %v45_v0  ;;  %v48_v3 = vmul.f32 (%p38_p11), 11.313708, %v46_v1  ;;  %s56_s5 = sshll.u32 (%p38_p11), %s304_s4, 4  ;;  %s57_s5 = int_to_ptr.vmem [resolvable:$true] %s56_s5 }
  0x2f   :  { %s260_s1 = scalar_lea.vmem (%p38_p11), %s57_s5, 256  ;;  %p265_p13 = scmp.lt.s32.totalorder (%p38_p11), %s57_s5, %s57_s5 }
  0x30   :  { %49 = vst [vmem:[#allocation6] sm:$0xff] (%p38_p11), %v47_v2  ;;  %50 = vst [vmem:[#allocation6 + $0x8] sm:$0xff] (%p38_p11), %v48_v3  ;;  %p261_p12 = scmp.ne.s32.totalorder (%p38_p11), %s57_s5, %s260_s1  ;;  %p266_p0 = scmp.lt.s32.totalorder (%p38_p11), %s260_s1, %s260_s1 }
  0x32   :  { %p267_p1 = por (%p38_p11), %p266_p0, %p265_p13 }
  0x34   :  { %p268_p2 = pnand %p267_p1, %p261_p12 }
  0x36   :  { %271 = shalt.err (!%p268_p2)
}
  0x37   :  { %s305_s6 = smov 128   ;;  %s306_s7 = smov 8  }
  0x38   :  { %62 = dma.vmem_to_hbm [thread:$0]  %s57_s5, 256, %s350_s2, [#allocation7], %s305_s6, %s305_s6, %s306_s7  }
  0x39   :  { %292 = dma.done.wait [#allocation7], 256  }
  0x3a   :  { %293 = vsyncadd [#allocation7], 4294967040 }
  0x3b   :  { %66 = vsyncpa [#allocation7], 1 }
  0x3c   :  { %67 = vsyncmov [#allocation3] }
  0x3f   :  { %s68_s10 = vpop.sfrf %67 }
  0x40   :  { %p194_p3 = scmp.ne.s32.totalorder %s68_s10, 0 }
  0x42   :  { %72 = shalt.err (%p194_p3)  }
  0x43   :  { %74 = vsyncmov [#allocation3 + $0x1] }
  0x46   :  { %s75_s11 = vpop.sfrf %74 }
  0x47   :  { %p195_p4 = scmp.ne.s32.totalorder %s75_s11, 0 }
  0x49   :  { %79 = shalt.err (%p195_p4)  }
  0x4a   :  { %81 = vsyncmov [#allocation3 + $0x2] }
  0x4d   :  { %s82_s12 = vpop.sfrf %81 }
  0x4e   :  { %p196_p5 = scmp.ne.s32.totalorder %s82_s12, 0 }
  0x50   :  { %86 = shalt.err (%p196_p5)  }
  0x51   :  { %88 = vsyncmov [#allocation3 + $0x3] }
  0x54   :  { %s89_s13 = vpop.sfrf %88 }
  0x55   :  { %p197_p6 = scmp.ne.s32.totalorder %s89_s13, 0 }
  0x57   :  { %93 = shalt.err (%p197_p6)  }
  0x58   :  { %95 = vsyncmov [#allocation3 + $0x4] }
  0x5b   :  { %s96_s2 = vpop.sfrf %95 }
  0x5c   :  { %p198_p7 = scmp.ne.s32.totalorder %s96_s2, 0 }
  0x5e   :  { %100 = shalt.err (%p198_p7)  }
  0x5f   :  { %102 = vsyncmov [#allocation3 + $0x5] }
  0x62   :  { %s103_s14 = vpop.sfrf %102 }
  0x63   :  { %p199_p8 = scmp.ne.s32.totalorder %s103_s14, 0 }
  0x65   :  { %107 = shalt.err (%p199_p8)  }
  0x66   :  { %109 = vsyncmov [#allocation3 + $0x6] }
  0x69   :  { %s110_s15 = vpop.sfrf %109 }
  0x6a   :  { %p200_p9 = scmp.ne.s32.totalorder %s110_s15, 0 }
  0x6c   :  { %114 = shalt.err (%p200_p9)  }
  0x6d   :  { %116 = vsyncmov [#allocation3 + $0x7] }
  0x70   :  { %s117_s16 = vpop.sfrf %116 }
  0x71   :  { %p201_p10 = scmp.ne.s32.totalorder %s117_s16, 0 }
  0x73   :  { %121 = shalt.err (%p201_p10)  }
  0x74   :  { %123 = vsyncmov [#allocation3 + $0x8] }
  0x77   :  { %s124_s0 = vpop.sfrf %123 }
  0x78   :  { %p202_p11 = scmp.ne.s32.totalorder %s124_s0, 0 }
  0x7a   :  { %128 = shalt.err (%p202_p11)  }
  0x7b   :  { %130 = vsyncmov [#allocation3 + $0x9] }
  0x7e   :  { %s131_s17 = vpop.sfrf %130 }
  0x7f   :  { %p203_p12 = scmp.ne.s32.totalorder %s131_s17, 0 }
  0x81   :  { %135 = shalt.err (%p203_p12)  }
  0x82   :  { %137 = vsyncmov [#allocation3 + $0xa] }
  0x85   :  { %s138_s18 = vpop.sfrf %137 }
  0x86   :  { %p204_p13 = scmp.ne.s32.totalorder %s138_s18, 0 }
  0x88   :  { %142 = shalt.err (%p204_p13)  }
  0x89   :  { %144 = vsyncmov [#allocation3 + $0xb] }
  0x8c   :  { %s145_s19 = vpop.sfrf %144 }
  0x8d   :  { %p205_p0 = scmp.ne.s32.totalorder %s145_s19, 0 }
  0x8f   :  { %149 = shalt.err (%p205_p0)  }
  0x90   :  { %151 = vsyncmov [#allocation3 + $0xc] }
  0x93   :  { %s152_s20 = vpop.sfrf %151 }
  0x94   :  { %p206_p1 = scmp.ne.s32.totalorder %s152_s20, 0 }
  0x96   :  { %156 = shalt.err (%p206_p1)  }
  0x97   :  { %158 = vsyncmov [#allocation3 + $0xd] }
  0x9a   :  { %s159_s21 = vpop.sfrf %158 }
  0x9b   :  { %p207_p2 = scmp.ne.s32.totalorder %s159_s21, 0 }
  0x9d   :  { %163 = shalt.err (%p207_p2)  }
  0x9e   :  { %165 = vsyncmov [#allocation3 + $0xe] }
  0xa1   :  { %s166_s22 = vpop.sfrf %165 }
  0xa2   :  { %p208_p3 = scmp.ne.s32.totalorder %s166_s22, 0 }
  0xa4   :  { %170 = shalt.err (%p208_p3)  }
  0xa5   :  { %172 = vsyncmov [#allocation3 + $0xf] }
  0xa8   :  { %s173_s23 = vpop.sfrf %172 }
  0xa9   :  { %p209_p4 = scmp.ne.s32.totalorder %s173_s23, 0 }
  0xab   :  { %177 = shalt.err (%p209_p4)  }

</bundles_post_ra>
